<compile_context>
chip_gen: v7x
topology: tpu7x:2x2x1
jax: 0.10.0
libtpu: 0.0.40
codegen_flags: <defaults>
</compile_context>

<pallas_src>
import jax
import jax.numpy as jnp
from jax.experimental import pallas as pl
from jax.experimental.pallas import tpu as pltpu


def exit_block_kernel(x_ref, w1_ref, b1_ref, w2_ref, b2_ref, o_ref):
    # Pooling is pre-folded into w1_ref, so this is: relu(x @ w1f + b1) @ w2 + b2.
    # No explicit upcast: MXU consumes bf16/f32 natively with f32 accumulation.
    h = jnp.dot(x_ref[...], w1_ref[...], preferred_element_type=jnp.float32)
    h = jnp.maximum(h + b1_ref[...], 0.0)                           # bias + ReLU (f32)
    out = jnp.dot(h, w2_ref[...], preferred_element_type=jnp.float32) + b2_ref[...]
    o_ref[...] = out.astype(o_ref.dtype)


def _round_up(a, m):
    return ((a + m - 1) // m) * m


def exit_block(x, w1, b1, w2, b2):
    """x: (N, C, L); w1: (C, H); b1: (1, H); w2: (H, O); b2: (1, O). Returns (N, O)."""
    N, C, L = x.shape
    H = w1.shape[1]
    O = w2.shape[1]
    CL = C * L
    x_dtype = x.dtype
    x_itemsize = jnp.dtype(x_dtype).itemsize

    # --- Fuse AdaptiveAvgPool1d(1) + Flatten + Linear(C->H) into one matmul:
    #     mean_L(x) @ w1  ==  x.reshape(N, C*L) @ (repeat(w1, L, axis=0) / L)
    # Fused weight is kept in the activation dtype (bf16 inputs stay bf16 on the
    # MXU); biases and the tiny second-layer weight stay f32.
    w1_fused = (jnp.repeat(w1.astype(jnp.float32), L, axis=0)
                / jnp.float32(L)).astype(x_dtype)                   # (C*L, H)
    b1_f = b1.astype(jnp.float32).reshape(1, H)
    w2_f = w2.astype(jnp.float32)                                   # (H, O)
    b2_f = b2.astype(jnp.float32).reshape(1, O)

    x2d = x.reshape(N, CL)

    # dtype-packed sublane multiple for the N axis.
    sub = {4: 8, 2: 16, 1: 32}.get(x_itemsize, 8)

    if N <= sub:
        # Single full-extent block: legal regardless of (8,128) divisibility.
        tile_n = N
    else:
        # Size the N tile from a VMEM budget that is safe on v7x (64 MiB phys /
        # 32 MiB scoped): 2x-double-buffered x and out tiles + resident weights.
        vmem_budget = 24 * 1024 * 1024
        resident_bytes = 2 * (CL * H * x_itemsize + H * 4 + H * O * 4 + O * 4)
        per_row_bytes = 2 * CL * x_itemsize + 2 * O * x_itemsize
        tile_n = (max(vmem_budget - resident_bytes, per_row_bytes * sub)
                  // per_row_bytes) // sub * sub
        tile_n = min(tile_n, 4096)
        # Keep >=2 grid steps so v7x's two TensorCores both get work and the
        # pipeline has something to overlap.
        tile_n = min(tile_n, _round_up(pl.cdiv(N, 2), sub))
        tile_n = max(tile_n, sub)

    # Partial last tile: out-of-range rows are read-padded and their writes
    # clipped by Pallas block boundary handling (compute is row-independent).
    grid = (pl.cdiv(N, tile_n),)

    out = pl.pallas_call(
        exit_block_kernel,
        out_shape=jax.ShapeDtypeStruct((N, O), x_dtype),
        grid_spec=pltpu.PrefetchScalarGridSpec(
            num_scalar_prefetch=0,
            grid=grid,
            in_specs=[
                pl.BlockSpec((tile_n, CL), lambda i: (i, 0)),  # x tile (pipelined over N)
                pl.BlockSpec((CL, H), lambda i: (0, 0)),       # resident fused weight 1
                pl.BlockSpec((1, H), lambda i: (0, 0)),        # resident bias 1
                pl.BlockSpec((H, O), lambda i: (0, 0)),        # resident weight 2
                pl.BlockSpec((1, O), lambda i: (0, 0)),        # resident bias 2
            ],
            # Narrow output block (last dim == full array dim O): masked vst in
            # the kernel, but only O*itemsize bytes/row of HBM writeback and no
            # wrapper-side slice.
            out_specs=pl.BlockSpec((tile_n, O), lambda i: (i, 0)),
        ),
        compiler_params=pltpu.CompilerParams(
            dimension_semantics=("parallel",),          # shard N tiles across TCs on v7x
            vmem_limit_bytes=32 * 1024 * 1024,          # explicit, safe on v5e/v6e/v7x
        ),
    )(x2d, w1_fused, b1_f, w2_f, b2_f)

    return out


def reference(x, w1, b1, w2, b2):
    pooled = jnp.mean(x, axis=-1)
    h = jnp.maximum(pooled @ w1 + b1, 0.0)
    return h @ w2 + b2


if __name__ == "__main__":
    # ExitBlock(in_channels=4, hidden_sizes=32, out_channels=8); input (N=2, C=4, L=16).
    N, C, L = 2, 4, 16
    H, O = 32, 8

    key = jax.random.PRNGKey(0)
    kx, k1, kb1, k2, kb2 = jax.random.split(key, 5)

    x = jax.random.normal(kx, (N, C, L), dtype=jnp.float32)

    # torch.nn.Linear-style uniform init (±1/sqrt(fan_in)), stored pre-transposed as (in, out).
    bound1 = 1.0 / jnp.sqrt(jnp.float32(C))
    w1 = jax.random.uniform(k1, (C, H), jnp.float32, -bound1, bound1)
    b1 = jax.random.uniform(kb1, (1, H), jnp.float32, -bound1, bound1)
    bound2 = 1.0 / jnp.sqrt(jnp.float32(H))
    w2 = jax.random.uniform(k2, (H, O), jnp.float32, -bound2, bound2)
    b2 = jax.random.uniform(kb2, (1, O), jnp.float32, -bound2, bound2)

    out = exit_block(x, w1, b1, w2, b2)
    out = jax.block_until_ready(out)

    ref = reference(x, w1, b1, w2, b2)
    assert out.shape == (N, O)
    assert jnp.allclose(out, ref, atol=1e-4, rtol=1e-4), (
        float(jnp.max(jnp.abs(out - ref))))

    print("KERNEL_OK")
</pallas_src>

<mosaic_0001>
module attributes {stable_mosaic.version = 11 : i64} {
  func.func @exit_block_kernel(%arg0: i32, %arg1: memref<2x64xf32, #tpu.memory_space<vmem>>, %arg2: memref<64x32xf32, #tpu.memory_space<vmem>>, %arg3: memref<1x32xf32, #tpu.memory_space<vmem>>, %arg4: memref<32x8xf32, #tpu.memory_space<vmem>>, %arg5: memref<1x8xf32, #tpu.memory_space<vmem>>, %arg6: memref<2x8xf32, #tpu.memory_space<vmem>>) attributes {dimension_semantics = [#tpu.dimension_semantics<parallel>], iteration_bounds = array<i64: 1>, scalar_prefetch = 0 : i64, scratch_operands = 0 : i64, tpu.core_type = #tpu.core_type<tc>, window_params = [{transform_indices = @transform_0, window_bounds = array<i64: 2, 64>}, {pipeline_mode = #tpu.pipeline_mode<synchronous>, transform_indices = @transform_1, window_bounds = array<i64: 64, 32>}, {pipeline_mode = #tpu.pipeline_mode<synchronous>, transform_indices = @transform_2, window_bounds = array<i64: 1, 32>}, {pipeline_mode = #tpu.pipeline_mode<synchronous>, transform_indices = @transform_3, window_bounds = array<i64: 32, 8>}, {pipeline_mode = #tpu.pipeline_mode<synchronous>, transform_indices = @transform_4, window_bounds = array<i64: 1, 8>}, {transform_indices = @transform_5, window_bounds = array<i64: 2, 8>}]} {
    %c0 = arith.constant 0 : index
    %c0_0 = arith.constant 0 : index
    %0 = vector.load %arg1[%c0, %c0_0] : memref<2x64xf32, #tpu.memory_space<vmem>>, vector<2x64xf32>
    %c0_1 = arith.constant 0 : index
    %c0_2 = arith.constant 0 : index
    %1 = vector.load %arg2[%c0_1, %c0_2] : memref<64x32xf32, #tpu.memory_space<vmem>>, vector<64x32xf32>
    %cst = arith.constant dense<0.000000e+00> : vector<2x32xf32>
    %2 = tpu.matmul %0, %1, %cst {dimension_numbers = #tpu.dot_dimension_numbers<[1], [0], [0], [1], [0, 0, 1, 1], [], []>} : vector<2x64xf32>, vector<64x32xf32>, vector<2x32xf32> -> vector<2x32xf32>
    %c0_3 = arith.constant 0 : index
    %c0_4 = arith.constant 0 : index
    %3 = vector.load %arg3[%c0_3, %c0_4] : memref<1x32xf32, #tpu.memory_space<vmem>>, vector<1x32xf32>
    %4 = vector.broadcast %3 : vector<1x32xf32> to vector<2x32xf32>
    %5 = arith.addf %2, %4 : vector<2x32xf32>
    %cst_5 = arith.constant 0.000000e+00 : f32
    %6 = vector.broadcast %cst_5 : f32 to vector<2x32xf32>
    %7 = arith.maximumf %5, %6 : vector<2x32xf32>
    %c0_6 = arith.constant 0 : index
    %c0_7 = arith.constant 0 : index
    %8 = vector.load %arg4[%c0_6, %c0_7] : memref<32x8xf32, #tpu.memory_space<vmem>>, vector<32x8xf32>
    %cst_8 = arith.constant dense<0.000000e+00> : vector<2x8xf32>
    %9 = tpu.matmul %7, %8, %cst_8 {dimension_numbers = #tpu.dot_dimension_numbers<[1], [0], [0], [1], [0, 0, 1, 1], [], []>} : vector<2x32xf32>, vector<32x8xf32>, vector<2x8xf32> -> vector<2x8xf32>
    %c0_9 = arith.constant 0 : index
    %c0_10 = arith.constant 0 : index
    %10 = vector.load %arg5[%c0_9, %c0_10] : memref<1x8xf32, #tpu.memory_space<vmem>>, vector<1x8xf32>
    %11 = vector.broadcast %10 : vector<1x8xf32> to vector<2x8xf32>
    %12 = arith.addf %9, %11 : vector<2x8xf32>
    %c0_11 = arith.constant 0 : index
    %c0_12 = arith.constant 0 : index
    %13 = vector.load %arg6[%c0_11, %c0_12] : memref<2x8xf32, #tpu.memory_space<vmem>>, vector<2x8xf32>
    tpu.vector_store %arg6[%c0_11, %c0_12], %12 {strides = array<i32>} : memref<2x8xf32, #tpu.memory_space<vmem>>, vector<2x8xf32>,
    return
  }
  func.func @transform_0(%arg0: i32) -> (i32, i32) {
    %c0_i32 = arith.constant 0 : i32
    %c0_i32_0 = arith.constant 0 : i32
    return %arg0, %c0_i32 : i32, i32
  }
  func.func @transform_1(%arg0: i32) -> (i32, i32) {
    %c0_i32 = arith.constant 0 : i32
    %c0_i32_0 = arith.constant 0 : i32
    %c0_i32_1 = arith.constant 0 : i32
    return %c0_i32, %c0_i32_0 : i32, i32
  }
  func.func @transform_2(%arg0: i32) -> (i32, i32) {
    %c0_i32 = arith.constant 0 : i32
    %c0_i32_0 = arith.constant 0 : i32
    %c0_i32_1 = arith.constant 0 : i32
    return %c0_i32, %c0_i32_0 : i32, i32
  }
  func.func @transform_3(%arg0: i32) -> (i32, i32) {
    %c0_i32 = arith.constant 0 : i32
    %c0_i32_0 = arith.constant 0 : i32
    %c0_i32_1 = arith.constant 0 : i32
    return %c0_i32, %c0_i32_0 : i32, i32
  }
  func.func @transform_4(%arg0: i32) -> (i32, i32) {
    %c0_i32 = arith.constant 0 : i32
    %c0_i32_0 = arith.constant 0 : i32
    %c0_i32_1 = arith.constant 0 : i32
    return %c0_i32, %c0_i32_0 : i32, i32
  }
  func.func @transform_5(%arg0: i32) -> (i32, i32) {
    %c0_i32 = arith.constant 0 : i32
    %c0_i32_0 = arith.constant 0 : i32
    return %arg0, %c0_i32 : i32, i32
  }
}

</mosaic_0001>

<bundles_post_ra>
// kernel: tpu_custom_call.1
= control target key start
LH: loop header
LB: loop body
LE: loop exit
PB: predicated region body
PF: predicated region fallthrough
CT: control target
= control target key end

     0   :  { %v307_v3 = vmov 0.0|0.0   ;;  %vm308_vm0 = vmmov 0   ;;  %v309_v6 = vmov 0.0   ;;  %s398_s0 = inlined_call_operand.vmem [shape: f32[2,64], index: 0, kind: input, shape index: {}]   ;;  %s399_s1 = inlined_call_operand.vmem [shape: f32[64,32], index: 1, kind: input, shape index: {}]   ;;  %s400_s2 = inlined_call_operand.vmem [shape: f32[1,32], index: 2, kind: input, shape index: {}]   ;;  %s401_s3 = inlined_call_operand.vmem [shape: f32[32,8], index: 3, kind: input, shape index: {}]   ;;  %s402_s4 = inlined_call_operand.vmem [shape: f32[1,8], index: 4, kind: input, shape index: {}]   ;;  %s403_s5 = inlined_call_operand.hbm [shape: f32[2,8], index: 5, kind: output, shape index: {}]  }
   0x1   :  { %v22_v0 = vld [vmem:[%s399_s1] sm:$0xff]  ;;  %v23_v1 = vld [vmem:[%s399_s1 + $0x8] sm:$0xff]  ;;  %v24_v2 = vld [vmem:[%s399_s1 + $0x10] sm:$0xff]  ;;  %261 = vmatprep.subr.bf16.mxu0 %v307_v3  ;;  %247 = vmatprep.mubr.msk.f32.mxu0 %vm308_vm0, %v309_v6 }
   0x2   :  { %v262_v4 = vpack.c.bf16 %v23_v1, %v22_v0  ;;  %v25_v5 = vld [vmem:[%s399_s1 + $0x18] sm:$0xff]  ;;  %273 = vmatprep.subr.bf16.mxu1 %v307_v3  ;;  %258 = vmatprep.mubr.msk.f32.mxu1 %vm308_vm0, %v309_v6  ;;  %v112_v8 = vld [vmem:[%s401_s3] sm:$0xff]  ;;  %v113_v9 = vld [vmem:[%s401_s3 + $0x8] sm:$0xff] }
   0x3   :  { %v265_v7 = vpack.c.bf16 %v25_v5, %v24_v2  ;;  %v26_v10 = vld [vmem:[%s399_s1 + $0x20] sm:$0xff]  ;;  %v27_v11 = vld [vmem:[%s399_s1 + $0x28] sm:$0xff]  ;;  %v274_v12 = vpack.c.bf16 %v113_v9, %v112_v8 }
   0x4   :  { %263 = vmatpush3.bf16.msra.mxu0 %v262_v4 }
   0x5   :  { %264 = vmatprep.subr.bf16.mxu0 %v307_v3 }
   0x6   :  { %10 = vsyncpa [#allocation3], 0  ;;  %275 = vmatpush3.bf16.msra.mxu1 %v274_v12  ;;  %v268_v13 = vpack.c.bf16 %v27_v11, %v26_v10  ;;  %v28_v14 = vld [vmem:[%s399_s1 + $0x30] sm:$0xff]  ;;  %v29_v15 = vld [vmem:[%s399_s1 + $0x38] sm:$0xff]  ;;  %vm37_vm1 = vcmask 523264   ;;  %vm123_vm2 = vcmask 261120  }
   0x7   :  { %276 = vmatprep.subr.bf16.mxu1 %v307_v3  ;;  %v271_v16 = vpack.c.bf16 %v29_v15, %v28_v14  ;;  %v21_v17 = vld [vmem:[%s398_s0] sm:$0x3]  ;;  %v114_v18 = vld [vmem:[%s401_s3 + $0x10] sm:$0xff]  ;;  %v115_v19 = vld [vmem:[%s401_s3 + $0x18] sm:$0xff]  ;;  %s310_s21 = smov [#allocation2]   ;;  %vm197_vm3 = vcmask 58368  }
   0x8   :  { %266 = vmatpush3.bf16.msra.mxu0 %v265_v7  ;;  %v277_v20 = vpack.c.bf16 %v115_v19, %v114_v18  ;;  %v213_v21 = vld [vmem:[%s400_s2] ss:$0 sm:$0xff]  ;;  %s205_s22 = sshll.u32 %s310_s21, 4  ;;  %s206_s22 = int_to_ptr.vmem [resolvable:$true] %s205_s22 }
   0x9   :  { %267 = vmatprep.subr.bf16.mxu0 %v307_v3  ;;  %v215_v26 = vld [vmem:[%s402_s4] ss:$0 sm:$0xff]  ;;  %s283_s3 = scalar_lea.vmem %s206_s22, 32  ;;  %p288_p1 = scmp.lt.s32.totalorder %s206_s22, %s206_s22 }
   0xa   :  { %278 = vmatpush3.bf16.msra.mxu1 %v277_v20  ;;  %p284_p0 = scmp.ne.s32.totalorder %s206_s22, %s283_s3  ;;  %p289_p2 = scmp.lt.s32.totalorder %s283_s3, %s283_s3 }
   0xc   :  { %269 = vmatpush3.bf16.msra.mxu0 %v268_v13  ;;  %p290_p3 = por %p289_p2, %p288_p1 }
   0xd   :  { %270 = vmatprep.subr.bf16.mxu0 %v307_v3 }
   0xe   :  { %p291_p4 = pnand %p290_p3, %p284_p0 }
  0x10   :  { %272 = vmatpush3.bf16.msra.mxu0 %v271_v16 }
  0x13   :  { %248 = vmatmul.mubr.msk.f32.vlgmr.msra.gmra.mrb[0].mxu0 %vm37_vm1, %v21_v17 }
  0xe6   :  { %v107_v22 = vpop.f32.mrb[0].mxu0 }
  0xe7   :  { %v108_v23 = vadd.f32 %v213_v21, %v107_v22  ;;  %v249_v24 = vpop.f32.mrb[1].mxu0 }
  0xe9   :  { %v111_v25 = vmax.f32 %v108_v23, 0.0 }
  0xeb   :  { %259 = vmatmul.mubr.msk.f32.vlgmr.msra.gmra.mrb[0].mxu1 %vm123_vm2, %v111_v25 }
 0x1be   :  { %v193_v27 = vpop.f32.mrb[0].mxu1 }
 0x1bf   :  { %v194_v28 = vadd.f32 %v215_v26, %v193_v27  ;;  %v260_v29 = vpop.f32.mrb[1].mxu1 }
 0x1c1   :  { %198 = vst.msk [vmem:[#allocation2] sm:$0x3] %vm197_vm3, %v194_v28 }
 0x1c2   :  { %294 = shalt.err (!%p291_p4)
}
 0x1c3   :  { %s295_s24 = scalar_lea.hbm %s403_s5, 32 }
 0x1c4   :  { %p296_p5 = scmp.ne.s32.totalorder %s403_s5, %s295_s24  ;;  %p299_p6 = scmp.lt.u32.totalorder %s295_s24, %s403_s5 }
 0x1c6   :  { %p301_p7 = pnand %p299_p6, %p296_p5 }
 0x1c8   :  { %304 = shalt.err (!%p301_p7)
}
 0x1c9   :  { %208 = dma.vmem_to_hbm [thread:$0]  %s206_s22, 32, %s403_s5, [#allocation3]  }
 0x1ca   :  { %305 = dma.done.wait [#allocation3], 32  }
 0x1cb   :  { %306 = vsyncadd [#allocation3], 4294967264 }
 0x1cc   :  { %212 = vsyncpa [#allocation3], 1 }

</bundles_post_ra>
